<compile_context>
chip_gen: v6e
topology: v6e:2x2x1
jax: 0.10.0
libtpu: 0.0.40
codegen_flags: <defaults>
</compile_context>

<pallas_src>
import jax
import jax.numpy as jnp
from jax.experimental import pallas as pl
from jax.experimental.pallas import tpu as pltpu

# ---- small, deterministic shapes consistent with MLP(input_size, output_size, depth=3) ----
B = 8            # batch (sublane-aligned)
IN_SIZE = 128    # input_size (scaled down from 2048; lane-dense)
OUT_SIZE = 256   # output_size (scaled down from 8192; multiple of 128 lanes)
EPS = 1e-5       # nn.BatchNorm1d default eps


def _vmem():
    return pl.BlockSpec(memory_space=pltpu.MemorySpace.VMEM)


# --------------- fused MLP kernel: (Linear -> BN -> ReLU) x2 -> Linear ----------------
def mlp_kernel(x_ref, w1, b1, g1, be1, w2, b2, g2, be2, w3, b3, out_ref):
    def bn_relu(h, g, be):
        # BatchNorm1d in training mode: batch mean / biased batch variance.
        # One pass: sum and sum-of-squares -> mean, E[x^2]; var = E[x^2] - mean^2.
        inv_n = 1.0 / h.shape[0]
        mean = jnp.sum(h, axis=0, keepdims=True) * inv_n
        mean_sq = jnp.sum(h * h, axis=0, keepdims=True) * inv_n
        var = mean_sq - mean * mean
        h = g[...] * (h - mean) * jax.lax.rsqrt(var + EPS) + be[...]
        return jnp.maximum(h, 0.0)

    h = jnp.dot(x_ref[...], w1[...], preferred_element_type=jnp.float32) + b1[...]
    h = bn_relu(h, g1, be1)
    h = jnp.dot(h, w2[...], preferred_element_type=jnp.float32) + b2[...]
    h = bn_relu(h, g2, be2)
    out_ref[...] = jnp.dot(h, w3[...], preferred_element_type=jnp.float32) + b3[...]


# --------------------------------- wrapper ---------------------------------------
def mlp_forward(x, params):
    # params: (w1, b1, g1, be1, w2, b2, g2, be2, w3, b3) -> 1 + 10 = 11 inputs
    return pl.pallas_call(
        mlp_kernel,
        out_shape=jax.ShapeDtypeStruct((B, OUT_SIZE), jnp.float32),
        in_specs=[_vmem()] * 11,
        out_specs=_vmem(),
    )(x, *params)


# ----------------------------- parameter init -------------------------------------
def linear_init(key, fan_in, shape):
    # matches PyTorch nn.Linear default: U(-1/sqrt(fan_in), 1/sqrt(fan_in))
    bound = 1.0 / jnp.sqrt(jnp.float32(fan_in))
    return jax.random.uniform(key, shape, jnp.float32, -bound, bound)


def make_params(key):
    ks = jax.random.split(key, 6)
    # Linear(IN_SIZE, OUT_SIZE) + BN(OUT_SIZE) + ReLU
    w1 = linear_init(ks[0], IN_SIZE, (IN_SIZE, OUT_SIZE))   # stored (in, out): y = x @ w + b
    b1 = linear_init(ks[1], IN_SIZE, (1, OUT_SIZE))
    g1 = jnp.ones((1, OUT_SIZE), jnp.float32)
    be1 = jnp.zeros((1, OUT_SIZE), jnp.float32)
    # Linear(OUT_SIZE, OUT_SIZE) + BN(OUT_SIZE) + ReLU
    w2 = linear_init(ks[2], OUT_SIZE, (OUT_SIZE, OUT_SIZE))
    b2 = linear_init(ks[3], OUT_SIZE, (1, OUT_SIZE))
    g2 = jnp.ones((1, OUT_SIZE), jnp.float32)
    be2 = jnp.zeros((1, OUT_SIZE), jnp.float32)
    # Linear(OUT_SIZE, OUT_SIZE)  (final layer, no BN/ReLU)
    w3 = linear_init(ks[4], OUT_SIZE, (OUT_SIZE, OUT_SIZE))
    b3 = linear_init(ks[5], OUT_SIZE, (1, OUT_SIZE))
    return (w1, b1, g1, be1, w2, b2, g2, be2, w3, b3)


# --------------------------- pure-JAX reference ------------------------------------
def reference_forward(x, params):
    w1, b1, g1, be1, w2, b2, g2, be2, w3, b3 = params

    def bn(h, g, be):
        m = h.mean(0, keepdims=True)
        v = ((h - m) ** 2).mean(0, keepdims=True)   # biased variance (training mode)
        return g * (h - m) / jnp.sqrt(v + EPS) + be

    h = jnp.maximum(bn(x @ w1 + b1, g1, be1), 0.0)
    h = jnp.maximum(bn(h @ w2 + b2, g2, be2), 0.0)
    return h @ w3 + b3


if __name__ == "__main__":
    key = jax.random.PRNGKey(0)
    kx, kp = jax.random.split(key)
    x = jax.random.normal(kx, (B, IN_SIZE), jnp.float32)
    params = make_params(kp)

    out = mlp_forward(x, params)
    out = jax.block_until_ready(out)

    ref = reference_forward(x, params)
    assert out.shape == (B, OUT_SIZE)
    assert jnp.allclose(out, ref, rtol=1e-2, atol=1e-2), "Pallas output mismatch vs reference"

    print("KERNEL_OK")
</pallas_src>

<mosaic_0001>
module attributes {stable_mosaic.version = 11 : i64} {
  func.func @mlp_kernel(%arg0: memref<8x128xf32, #tpu.memory_space<vmem>>, %arg1: memref<128x256xf32, #tpu.memory_space<vmem>>, %arg2: memref<1x256xf32, #tpu.memory_space<vmem>>, %arg3: memref<1x256xf32, #tpu.memory_space<vmem>>, %arg4: memref<1x256xf32, #tpu.memory_space<vmem>>, %arg5: memref<256x256xf32, #tpu.memory_space<vmem>>, %arg6: memref<1x256xf32, #tpu.memory_space<vmem>>, %arg7: memref<1x256xf32, #tpu.memory_space<vmem>>, %arg8: memref<1x256xf32, #tpu.memory_space<vmem>>, %arg9: memref<256x256xf32, #tpu.memory_space<vmem>>, %arg10: memref<1x256xf32, #tpu.memory_space<vmem>>, %arg11: memref<8x256xf32, #tpu.memory_space<vmem>>) attributes {dimension_semantics = [], scalar_prefetch = 0 : i64, scratch_operands = 0 : i64, tpu.core_type = #tpu.core_type<tc>} {
    %c0 = arith.constant 0 : index
    %c0_0 = arith.constant 0 : index
    %0 = vector.load %arg0[%c0, %c0_0] : memref<8x128xf32, #tpu.memory_space<vmem>>, vector<8x128xf32>
    %c0_1 = arith.constant 0 : index
    %c0_2 = arith.constant 0 : index
    %1 = vector.load %arg1[%c0_1, %c0_2] : memref<128x256xf32, #tpu.memory_space<vmem>>, vector<128x256xf32>
    %cst = arith.constant dense<0.000000e+00> : vector<8x256xf32>
    %2 = tpu.matmul %0, %1, %cst {dimension_numbers = #tpu.dot_dimension_numbers<[1], [0], [0], [1], [0, 0, 1, 1], [], []>} : vector<8x128xf32>, vector<128x256xf32>, vector<8x256xf32> -> vector<8x256xf32>
    %c0_3 = arith.constant 0 : index
    %c0_4 = arith.constant 0 : index
    %3 = vector.load %arg2[%c0_3, %c0_4] : memref<1x256xf32, #tpu.memory_space<vmem>>, vector<1x256xf32>
    %4 = vector.broadcast %3 : vector<1x256xf32> to vector<8x256xf32>
    %5 = arith.addf %2, %4 : vector<8x256xf32>
    %cst_5 = arith.constant dense<0.000000e+00> : vector<256xf32>
    %6 = vector.multi_reduction <add>, %5, %cst_5 [0] : vector<8x256xf32> to vector<256xf32>
    %7 = vector.shape_cast %6 : vector<256xf32> to vector<1x256xf32>
    %cst_6 = arith.constant 1.250000e-01 : f32
    %8 = vector.broadcast %cst_6 : f32 to vector<1x256xf32>
    %9 = arith.mulf %7, %8 : vector<1x256xf32>
    %10 = arith.mulf %5, %5 : vector<8x256xf32>
    %cst_7 = arith.constant dense<0.000000e+00> : vector<256xf32>
    %11 = vector.multi_reduction <add>, %10, %cst_7 [0] : vector<8x256xf32> to vector<256xf32>
    %12 = vector.shape_cast %11 : vector<256xf32> to vector<1x256xf32>
    %cst_8 = arith.constant 1.250000e-01 : f32
    %13 = vector.broadcast %cst_8 : f32 to vector<1x256xf32>
    %14 = arith.mulf %12, %13 : vector<1x256xf32>
    %15 = arith.mulf %9, %9 : vector<1x256xf32>
    %16 = arith.subf %14, %15 : vector<1x256xf32>
    %c0_9 = arith.constant 0 : index
    %c0_10 = arith.constant 0 : index
    %17 = vector.load %arg3[%c0_9, %c0_10] : memref<1x256xf32, #tpu.memory_space<vmem>>, vector<1x256xf32>
    %18 = vector.broadcast %9 : vector<1x256xf32> to vector<8x256xf32>
    %19 = arith.subf %5, %18 : vector<8x256xf32>
    %20 = vector.broadcast %17 : vector<1x256xf32> to vector<8x256xf32>
    %21 = arith.mulf %20, %19 : vector<8x256xf32>
    %cst_11 = arith.constant 9.99999974E-6 : f32
    %22 = vector.broadcast %cst_11 : f32 to vector<1x256xf32>
    %23 = arith.addf %16, %22 : vector<1x256xf32>
    %24 = math.rsqrt %23 : vector<1x256xf32>
    %25 = vector.broadcast %24 : vector<1x256xf32> to vector<8x256xf32>
    %26 = arith.mulf %21, %25 : vector<8x256xf32>
    %c0_12 = arith.constant 0 : index
    %c0_13 = arith.constant 0 : index
    %27 = vector.load %arg4[%c0_12, %c0_13] : memref<1x256xf32, #tpu.memory_space<vmem>>, vector<1x256xf32>
    %28 = vector.broadcast %27 : vector<1x256xf32> to vector<8x256xf32>
    %29 = arith.addf %26, %28 : vector<8x256xf32>
    %cst_14 = arith.constant 0.000000e+00 : f32
    %30 = vector.broadcast %cst_14 : f32 to vector<8x256xf32>
    %31 = arith.maximumf %29, %30 : vector<8x256xf32>
    %c0_15 = arith.constant 0 : index
    %c0_16 = arith.constant 0 : index
    %32 = vector.load %arg5[%c0_15, %c0_16] : memref<256x256xf32, #tpu.memory_space<vmem>>, vector<256x256xf32>
    %cst_17 = arith.constant dense<0.000000e+00> : vector<8x256xf32>
    %33 = tpu.matmul %31, %32, %cst_17 {dimension_numbers = #tpu.dot_dimension_numbers<[1], [0], [0], [1], [0, 0, 1, 1], [], []>} : vector<8x256xf32>, vector<256x256xf32>, vector<8x256xf32> -> vector<8x256xf32>
    %c0_18 = arith.constant 0 : index
    %c0_19 = arith.constant 0 : index
    %34 = vector.load %arg6[%c0_18, %c0_19] : memref<1x256xf32, #tpu.memory_space<vmem>>, vector<1x256xf32>
    %35 = vector.broadcast %34 : vector<1x256xf32> to vector<8x256xf32>
    %36 = arith.addf %33, %35 : vector<8x256xf32>
    %cst_20 = arith.constant dense<0.000000e+00> : vector<256xf32>
    %37 = vector.multi_reduction <add>, %36, %cst_20 [0] : vector<8x256xf32> to vector<256xf32>
    %38 = vector.shape_cast %37 : vector<256xf32> to vector<1x256xf32>
    %cst_21 = arith.constant 1.250000e-01 : f32
    %39 = vector.broadcast %cst_21 : f32 to vector<1x256xf32>
    %40 = arith.mulf %38, %39 : vector<1x256xf32>
    %41 = arith.mulf %36, %36 : vector<8x256xf32>
    %cst_22 = arith.constant dense<0.000000e+00> : vector<256xf32>
    %42 = vector.multi_reduction <add>, %41, %cst_22 [0] : vector<8x256xf32> to vector<256xf32>
    %43 = vector.shape_cast %42 : vector<256xf32> to vector<1x256xf32>
    %cst_23 = arith.constant 1.250000e-01 : f32
    %44 = vector.broadcast %cst_23 : f32 to vector<1x256xf32>
    %45 = arith.mulf %43, %44 : vector<1x256xf32>
    %46 = arith.mulf %40, %40 : vector<1x256xf32>
    %47 = arith.subf %45, %46 : vector<1x256xf32>
    %c0_24 = arith.constant 0 : index
    %c0_25 = arith.constant 0 : index
    %48 = vector.load %arg7[%c0_24, %c0_25] : memref<1x256xf32, #tpu.memory_space<vmem>>, vector<1x256xf32>
    %49 = vector.broadcast %40 : vector<1x256xf32> to vector<8x256xf32>
    %50 = arith.subf %36, %49 : vector<8x256xf32>
    %51 = vector.broadcast %48 : vector<1x256xf32> to vector<8x256xf32>
    %52 = arith.mulf %51, %50 : vector<8x256xf32>
    %cst_26 = arith.constant 9.99999974E-6 : f32
    %53 = vector.broadcast %cst_26 : f32 to vector<1x256xf32>
    %54 = arith.addf %47, %53 : vector<1x256xf32>
    %55 = math.rsqrt %54 : vector<1x256xf32>
    %56 = vector.broadcast %55 : vector<1x256xf32> to vector<8x256xf32>
    %57 = arith.mulf %52, %56 : vector<8x256xf32>
    %c0_27 = arith.constant 0 : index
    %c0_28 = arith.constant 0 : index
    %58 = vector.load %arg8[%c0_27, %c0_28] : memref<1x256xf32, #tpu.memory_space<vmem>>, vector<1x256xf32>
    %59 = vector.broadcast %58 : vector<1x256xf32> to vector<8x256xf32>
    %60 = arith.addf %57, %59 : vector<8x256xf32>
    %cst_29 = arith.constant 0.000000e+00 : f32
    %61 = vector.broadcast %cst_29 : f32 to vector<8x256xf32>
    %62 = arith.maximumf %60, %61 : vector<8x256xf32>
    %c0_30 = arith.constant 0 : index
    %c0_31 = arith.constant 0 : index
    %63 = vector.load %arg9[%c0_30, %c0_31] : memref<256x256xf32, #tpu.memory_space<vmem>>, vector<256x256xf32>
    %cst_32 = arith.constant dense<0.000000e+00> : vector<8x256xf32>
    %64 = tpu.matmul %62, %63, %cst_32 {dimension_numbers = #tpu.dot_dimension_numbers<[1], [0], [0], [1], [0, 0, 1, 1], [], []>} : vector<8x256xf32>, vector<256x256xf32>, vector<8x256xf32> -> vector<8x256xf32>
    %c0_33 = arith.constant 0 : index
    %c0_34 = arith.constant 0 : index
    %65 = vector.load %arg10[%c0_33, %c0_34] : memref<1x256xf32, #tpu.memory_space<vmem>>, vector<1x256xf32>
    %66 = vector.broadcast %65 : vector<1x256xf32> to vector<8x256xf32>
    %67 = arith.addf %64, %66 : vector<8x256xf32>
    %c0_35 = arith.constant 0 : index
    %c0_36 = arith.constant 0 : index
    %68 = vector.load %arg11[%c0_35, %c0_36] : memref<8x256xf32, #tpu.memory_space<vmem>>, vector<8x256xf32>
    tpu.vector_store %arg11[%c0_35, %c0_36], %67 {strides = array<i32>} : memref<8x256xf32, #tpu.memory_space<vmem>>, vector<8x256xf32>,
    return
  }
}

</mosaic_0001>

<bundles_post_ra>
// kernel: tpu_custom_call.1
= control target key start
LH: loop header
LB: loop body
LE: loop exit
PB: predicated region body
PF: predicated region fallthrough
CT: control target
= control target key end

     0   :  { %16 = vsyncpa [#allocation3], 0  ;;  %s920_s0 = inlined_call_operand.hbm [shape: f32[8,128], index: 0, kind: input, shape index: {}]   ;;  %s921_s1 = inlined_call_operand.hbm [shape: f32[128,256], index: 1, kind: input, shape index: {}]   ;;  %s922_s2 = inlined_call_operand.vmem [shape: f32[1,256], index: 2, kind: input, shape index: {}]   ;;  %s923_s3 = inlined_call_operand.vmem [shape: f32[1,256], index: 3, kind: input, shape index: {}]   ;;  %s924_s4 = inlined_call_operand.vmem [shape: f32[1,256], index: 4, kind: input, shape index: {}]   ;;  %s925_s5 = inlined_call_operand.hbm [shape: f32[256,256], index: 5, kind: input, shape index: {}]   ;;  %s926_s6 = inlined_call_operand.vmem [shape: f32[1,256], index: 6, kind: input, shape index: {}]   ;;  %s927_s7 = inlined_call_operand.vmem [shape: f32[1,256], index: 7, kind: input, shape index: {}]   ;;  %s928_s8 = inlined_call_operand.vmem [shape: f32[1,256], index: 8, kind: input, shape index: {}]   ;;  %s929_s9 = inlined_call_operand.hbm [shape: f32[256,256], index: 9, kind: input, shape index: {}]   ;;  %s930_s10 = inlined_call_operand.vmem [shape: f32[1,256], index: 10, kind: input, shape index: {}]   ;;  %s931_s11 = inlined_call_operand.hbm [shape: f32[8,256], index: 11, kind: output, shape index: {}]  }
   0x1   :  { %17 = vsyncpa [#allocation6], 0 }
   0x2   :  { %18 = vsyncpa [#allocation9], 0 }
   0x3   :  { %19 = vsyncpa [#allocation4], 0  ;;  %s789_s17 = smov [#allocation5]  }
   0x4   :  { %s35_s18 = sshll.u32 %s789_s17, 4  ;;  %s36_s18 = int_to_ptr.vmem [resolvable:$true] %s35_s18 }
   0x5   :  { %s689_s19 = scalar_lea.vmem %s36_s18, 4096  ;;  %p694_p1 = scmp.lt.s32.totalorder %s36_s18, %s36_s18 }
   0x6   :  { %p690_p0 = scmp.ne.s32.totalorder %s36_s18, %s689_s19  ;;  %p695_p2 = scmp.lt.s32.totalorder %s689_s19, %s689_s19 }
   0x8   :  { %p696_p3 = por %p695_p2, %p694_p1 }
   0xa   :  { %p697_p4 = pnand %p696_p3, %p690_p0 }
   0xc   :  { %700 = shalt.err (!%p697_p4)
}
   0xd   :  { %s790_s20 = smov 256   ;;  %s791_s21 = smov 16  }
   0xe   :  { %41 = dma.hbm_to_vmem [thread:$0]  %s921_s1, 4096, %s36_s18, [#allocation6], %s790_s20, %s790_s20, %s791_s21  }
   0xf   :  { %s792_s24 = smov [#allocation2]   ;;  %s793_s26 = smov [#allocation7]  }
  0x10   :  { %s26_s25 = sshll.u32 %s792_s24, 4  ;;  %s53_s27 = sshll.u32 %s793_s26, 4  ;;  %s27_s25 = int_to_ptr.vmem [resolvable:$true] %s26_s25  ;;  %s54_s27 = int_to_ptr.vmem [resolvable:$true] %s53_s27 }
  0x11   :  { %s709_s28 = scalar_lea.vmem %s27_s25, 128  ;;  %p714_p6 = scmp.lt.s32.totalorder %s27_s25, %s27_s25 }
  0x12   :  { %p710_p5 = scmp.ne.s32.totalorder %s27_s25, %s709_s28  ;;  %p715_p7 = scmp.lt.s32.totalorder %s709_s28, %s709_s28 }
  0x14   :  { %p716_p8 = por %p715_p7, %p714_p6 }
  0x16   :  { %p717_p9 = pnand %p716_p8, %p710_p5 }
  0x18   :  { %720 = shalt.err (!%p717_p9)
}
  0x19   :  { %29 = dma.hbm_to_vmem [thread:$0]  %s920_s0, 128, %s27_s25, [#allocation3]  }
  0x1a   :  { %s729_s12 = scalar_lea.vmem %s54_s27, 8192  ;;  %p734_p11 = scmp.lt.s32.totalorder %s54_s27, %s54_s27 }
  0x1b   :  { %p730_p10 = scmp.ne.s32.totalorder %s54_s27, %s729_s12  ;;  %p735_p12 = scmp.lt.s32.totalorder %s729_s12, %s729_s12 }
  0x1d   :  { %p736_p13 = por %p735_p12, %p734_p11 }
  0x1f   :  { %p737_p0 = pnand %p736_p13, %p730_p10 }
  0x21   :  { %740 = shalt.err (!%p737_p0)
}
  0x22   :  { %59 = dma.hbm_to_vmem [thread:$0]  %s925_s5, 8192, %s54_s27, [#allocation6], %s790_s20, %s790_s20, %s791_s21  }
  0x23   :  { %s794_s14 = smov [#allocation8]  }
  0x24   :  { %s71_s15 = sshll.u32 %s794_s14, 4  ;;  %s72_s15 = int_to_ptr.vmem [resolvable:$true] %s71_s15 }
  0x25   :  { %s749_s16 = scalar_lea.vmem %s72_s15, 8192  ;;  %p754_p2 = scmp.lt.s32.totalorder %s72_s15, %s72_s15 }
  0x26   :  { %p750_p1 = scmp.ne.s32.totalorder %s72_s15, %s749_s16  ;;  %p755_p3 = scmp.lt.s32.totalorder %s749_s16, %s749_s16 }
  0x28   :  { %p756_p4 = por %p755_p3, %p754_p2 }
  0x2a   :  { %p757_p5 = pnand %p756_p4, %p750_p1 }
  0x2c   :  { %760 = shalt.err (!%p757_p5)
}
  0x2d   :  { %77 = dma.hbm_to_vmem [thread:$0]  %s929_s9, 8192, %s72_s15, [#allocation9], %s790_s20, %s790_s20, %s791_s21  }
  0x2e   :  { %781 = dma.done.wait [#allocation3], 128  }
  0x2f   :  { %782 = vsyncadd [#allocation3], 4294967168 }
  0x30   :  { %783 = dma.done.wait [#allocation6], 12288  }
  0x31   :  { %784 = vsyncadd [#allocation6], 4294955008 }
  0x32   :  { %785 = dma.done.wait [#allocation9], 8192  }
  0x33   :  { %786 = vsyncadd [#allocation9], 4294959104  ;;  %v795_v0 = vmov 0.0   ;;  %v124_v1 = vld [vmem:[#allocation5 + $0xf8] sm:$0xff]  ;;  %v123_v2 = vld [vmem:[#allocation5 + $0xf0] sm:$0xff] }
  0x34   :  { %201 = vmatprep.mubr.f32.mxu0 %v795_v0  ;;  %v122_v3 = vld [vmem:[#allocation5 + $0xe8] sm:$0xff]  ;;  %137 = vmatprep.subr.mxu0 %v124_v1  ;;  %v121_v4 = vld [vmem:[#allocation5 + $0xe0] sm:$0xff]  ;;  %v120_v5 = vld [vmem:[#allocation5 + $0xd8] sm:$0xff] }
  0x35   :  { %138 = vmatpush1.msra.mxu0 %v123_v2  ;;  %v119_v6 = vld [vmem:[#allocation5 + $0xd0] sm:$0xff]  ;;  %v118_v7 = vld [vmem:[#allocation5 + $0xc8] sm:$0xff]  ;;  %v117_v8 = vld [vmem:[#allocation5 + $0xc0] sm:$0xff] }
  0x36   :  { %139 = vmatprep.subr.mxu0 %v122_v3  ;;  %v116_v9 = vld [vmem:[#allocation5 + $0xb8] sm:$0xff]  ;;  %v115_v10 = vld [vmem:[#allocation5 + $0xb0] sm:$0xff]  ;;  %v114_v11 = vld [vmem:[#allocation5 + $0xa8] sm:$0xff] }
  0x37   :  { %140 = vmatpush1.msra.mxu0 %v121_v4  ;;  %v113_v12 = vld [vmem:[#allocation5 + $0xa0] sm:$0xff]  ;;  %v112_v13 = vld [vmem:[#allocation5 + $0x98] sm:$0xff]  ;;  %v111_v14 = vld [vmem:[#allocation5 + $0x90] sm:$0xff] }
  0x38   :  { %141 = vmatprep.subr.mxu0 %v120_v5  ;;  %v311_v15 = vld [vmem:[#allocation7 + $0xf8] sm:$0xff]  ;;  %v310_v16 = vld [vmem:[#allocation7 + $0xf0] sm:$0xff]  ;;  %v309_v17 = vld [vmem:[#allocation7 + $0xe8] sm:$0xff] }
  0x39   :  { %142 = vmatpush1.msra.mxu0 %v119_v6  ;;  %v110_v18 = vld [vmem:[#allocation5 + $0x88] sm:$0xff]  ;;  %356 = vmatprep.subr.mxu1 %v311_v15  ;;  %v308_v19 = vld [vmem:[#allocation7 + $0xe0] sm:$0xff]  ;;  %v307_v21 = vld [vmem:[#allocation7 + $0xd8] sm:$0xff] }
  0x3a   :  { %143 = vmatprep.subr.mxu0 %v118_v7  ;;  %v109_v20 = vld [vmem:[#allocation5 + $0x80] sm:$0xff]  ;;  %357 = vmatpush1.msra.mxu1 %v310_v16  ;;  %v108_v22 = vld [vmem:[#allocation5 + $0x78] sm:$0xff]  ;;  %v306_v23 = vld [vmem:[#allocation7 + $0xd0] sm:$0xff] }
  0x3b   :  { %144 = vmatpush1.msra.mxu0 %v117_v8  ;;  %358 = vmatprep.subr.mxu1 %v309_v17  ;;  %v107_v24 = vld [vmem:[#allocation5 + $0x70] sm:$0xff]  ;;  %v305_v25 = vld [vmem:[#allocation7 + $0xc8] sm:$0xff]  ;;  %v304_v27 = vld [vmem:[#allocation7 + $0xc0] sm:$0xff] }
  0x3c   :  { %145 = vmatprep.subr.mxu0 %v116_v9  ;;  %359 = vmatpush1.msra.mxu1 %v308_v19  ;;  %v106_v26 = vld [vmem:[#allocation5 + $0x68] sm:$0xff]  ;;  %v105_v28 = vld [vmem:[#allocation5 + $0x60] sm:$0xff]  ;;  %v303_v29 = vld [vmem:[#allocation7 + $0xb8] sm:$0xff] }
  0x3d   :  { %146 = vmatpush1.msra.mxu0 %v115_v10  ;;  %360 = vmatprep.subr.mxu1 %v307_v21  ;;  %v104_v30 = vld [vmem:[#allocation5 + $0x58] sm:$0xff]  ;;  %v302_v31 = vld [vmem:[#allocation7 + $0xb0] sm:$0xff]  ;;  %v301_v33 = vld [vmem:[#allocation7 + $0xa8] sm:$0xff] }
  0x3e   :  { %147 = vmatprep.subr.mxu0 %v114_v11  ;;  %361 = vmatpush1.msra.mxu1 %v306_v23  ;;  %v103_v32 = vld [vmem:[#allocation5 + $0x50] sm:$0xff]  ;;  %v102_v34 = vld [vmem:[#allocation5 + $0x48] sm:$0xff]  ;;  %v300_v35 = vld [vmem:[#allocation7 + $0xa0] sm:$0xff] }
  0x3f   :  { %148 = vmatpush1.msra.mxu0 %v113_v12  ;;  %362 = vmatprep.subr.mxu1 %v305_v25  ;;  %v101_v36 = vld [vmem:[#allocation5 + $0x40] sm:$0xff]  ;;  %v299_v37 = vld [vmem:[#allocation7 + $0x98] sm:$0xff]  ;;  %v298_v39 = vld [vmem:[#allocation7 + $0x90] sm:$0xff] }
  0x40   :  { %149 = vmatprep.subr.mxu0 %v112_v13  ;;  %363 = vmatpush1.msra.mxu1 %v304_v27  ;;  %v100_v38 = vld [vmem:[#allocation5 + $0x38] sm:$0xff]  ;;  %v99_v40 = vld [vmem:[#allocation5 + $0x30] sm:$0xff]  ;;  %v297_v41 = vld [vmem:[#allocation7 + $0x88] sm:$0xff] }
  0x41   :  { %150 = vmatpush1.msra.mxu0 %v111_v14  ;;  %364 = vmatprep.subr.mxu1 %v303_v29  ;;  %v98_v42 = vld [vmem:[#allocation5 + $0x28] sm:$0xff]  ;;  %v296_v43 = vld [vmem:[#allocation7 + $0x80] sm:$0xff]  ;;  %v295_v45 = vld [vmem:[#allocation7 + $0x78] sm:$0xff] }
  0x42   :  { %151 = vmatprep.subr.mxu0 %v110_v18  ;;  %365 = vmatpush1.msra.mxu1 %v302_v31  ;;  %v97_v44 = vld [vmem:[#allocation5 + $0x20] sm:$0xff]  ;;  %v96_v46 = vld [vmem:[#allocation5 + $0x18] sm:$0xff]  ;;  %v294_v47 = vld [vmem:[#allocation7 + $0x70] sm:$0xff] }
  0x43   :  { %152 = vmatpush1.msra.mxu0 %v109_v20  ;;  %366 = vmatprep.subr.mxu1 %v301_v33  ;;  %v95_v48 = vld [vmem:[#allocation5 + $0x10] sm:$0xff]  ;;  %v94_v49 = vld [vmem:[#allocation5 + $0x8] sm:$0xff]  ;;  %v93_v50 = vld [vmem:[#allocation5] sm:$0xff] }
  0x44   :  { %153 = vmatprep.subr.mxu0 %v108_v22  ;;  %367 = vmatpush1.msra.mxu1 %v300_v35  ;;  %v92_v51 = vld [vmem:[#allocation2] sm:$0xff]  ;;  %v293_v52 = vld [vmem:[#allocation7 + $0x68] sm:$0xff]  ;;  %v292_v53 = vld [vmem:[#allocation7 + $0x60] sm:$0xff] }
  0x45   :  { %154 = vmatpush1.msra.mxu0 %v107_v24  ;;  %368 = vmatprep.subr.mxu1 %v299_v37  ;;  %v291_v54 = vld [vmem:[#allocation7 + $0x58] sm:$0xff]  ;;  %v290_v55 = vld [vmem:[#allocation7 + $0x50] sm:$0xff]  ;;  %v289_v56 = vld [vmem:[#allocation7 + $0x48] sm:$0xff] }
  0x46   :  { %155 = vmatprep.subr.mxu0 %v106_v26  ;;  %369 = vmatpush1.msra.mxu1 %v298_v39  ;;  %v288_v57 = vld [vmem:[#allocation7 + $0x40] sm:$0xff]  ;;  %v287_v58 = vld [vmem:[#allocation7 + $0x38] sm:$0xff]  ;;  %v286_v59 = vld [vmem:[#allocation7 + $0x30] sm:$0xff] }
  0x47   :  { %156 = vmatpush1.msra.mxu0 %v105_v28  ;;  %370 = vmatprep.subr.mxu1 %v297_v41  ;;  %v285_v60 = vld [vmem:[#allocation7 + $0x28] sm:$0xff]  ;;  %v284_v61 = vld [vmem:[#allocation7 + $0x20] sm:$0xff]  ;;  %v283_v62 = vld [vmem:[#allocation7 + $0x18] sm:$0xff] }
  0x48   :  { %157 = vmatprep.subr.mxu0 %v104_v30  ;;  %371 = vmatpush1.msra.mxu1 %v296_v43  ;;  %v282_v63 = vld [vmem:[#allocation7 + $0x10] sm:$0xff]  ;;  %v281_v0 = vld [vmem:[#allocation7 + $0x8] sm:$0xff]  ;;  %v280_v1 = vld [vmem:[#allocation7] sm:$0xff] }
  0x49   :  { %158 = vmatpush1.msra.mxu0 %v103_v32  ;;  %372 = vmatprep.subr.mxu1 %v295_v45  ;;  %v343_v2 = vld [vmem:[#allocation7 + $0x1f8] sm:$0xff]  ;;  %v342_v3 = vld [vmem:[#allocation7 + $0x1f0] sm:$0xff]  ;;  %v341_v4 = vld [vmem:[#allocation7 + $0x1e8] sm:$0xff] }
  0x4a   :  { %159 = vmatprep.subr.mxu0 %v102_v34  ;;  %373 = vmatpush1.msra.mxu1 %v294_v47  ;;  %v340_v5 = vld [vmem:[#allocation7 + $0x1e0] sm:$0xff]  ;;  %v339_v6 = vld [vmem:[#allocation7 + $0x1d8] sm:$0xff]  ;;  %v338_v7 = vld [vmem:[#allocation7 + $0x1d0] sm:$0xff] }
  0x4b   :  { %160 = vmatpush1.msra.mxu0 %v101_v36  ;;  %374 = vmatprep.subr.mxu1 %v293_v52  ;;  %v337_v8 = vld [vmem:[#allocation7 + $0x1c8] sm:$0xff]  ;;  %v336_v9 = vld [vmem:[#allocation7 + $0x1c0] sm:$0xff]  ;;  %v335_v10 = vld [vmem:[#allocation7 + $0x1b8] sm:$0xff]  ;;  %v127_v52 = vlaneseq }
  0x4c   :  { %161 = vmatprep.subr.mxu0 %v100_v38  ;;  %375 = vmatpush1.msra.mxu1 %v292_v53  ;;  %v334_v11 = vld [vmem:[#allocation7 + $0x1b0] sm:$0xff]  ;;  %v333_v12 = vld [vmem:[#allocation7 + $0x1a8] sm:$0xff]  ;;  %v332_v13 = vld [vmem:[#allocation7 + $0x1a0] sm:$0xff] }
  0x4d   :  { %162 = vmatpush1.msra.mxu0 %v99_v40  ;;  %376 = vmatprep.subr.mxu1 %v291_v54  ;;  %v331_v14 = vld [vmem:[#allocation7 + $0x198] sm:$0xff]  ;;  %v330_v15 = vld [vmem:[#allocation7 + $0x190] sm:$0xff]  ;;  %v329_v16 = vld [vmem:[#allocation7 + $0x188] sm:$0xff]  ;;  %v128_v53 = vshrl.u32 %v127_v52, 7 }
  0x4e   :  { %163 = vmatprep.subr.mxu0 %v98_v42  ;;  %377 = vmatpush1.msra.mxu1 %v290_v55  ;;  %v328_v17 = vld [vmem:[#allocation7 + $0x180] sm:$0xff]  ;;  %v327_v18 = vld [vmem:[#allocation7 + $0x178] sm:$0xff]  ;;  %v326_v19 = vld [vmem:[#allocation7 + $0x170] sm:$0xff] }
  0x4f   :  { %164 = vmatpush1.msra.mxu0 %v97_v44  ;;  %378 = vmatprep.subr.mxu1 %v289_v56  ;;  %v325_v20 = vld [vmem:[#allocation7 + $0x168] sm:$0xff]  ;;  %v324_v21 = vld [vmem:[#allocation7 + $0x160] sm:$0xff]  ;;  %v323_v22 = vld [vmem:[#allocation7 + $0x158] sm:$0xff]  ;;  %v878_v54 = vsub.s32 0, %v128_v53  ;;  %v883_v56 = vsub.s32 1, %v128_v53 }
  0x50   :  { %165 = vmatprep.subr.mxu0 %v96_v46  ;;  %379 = vmatpush1.msra.mxu1 %v288_v57  ;;  %v322_v23 = vld [vmem:[#allocation7 + $0x150] sm:$0xff]  ;;  %v321_v24 = vld [vmem:[#allocation7 + $0x148] sm:$0xff]  ;;  %v320_v25 = vld [vmem:[#allocation7 + $0x140] sm:$0xff] }
  0x51   :  { %166 = vmatpush1.msra.mxu0 %v95_v48  ;;  %380 = vmatprep.subr.mxu1 %v287_v58  ;;  %v319_v26 = vld [vmem:[#allocation7 + $0x138] sm:$0xff]  ;;  %v318_v27 = vld [vmem:[#allocation7 + $0x130] sm:$0xff]  ;;  %v317_v28 = vld [vmem:[#allocation7 + $0x128] sm:$0xff] }
  0x52   :  { %167 = vmatprep.subr.mxu0 %v94_v49  ;;  %381 = vmatpush1.msra.mxu1 %v286_v59  ;;  %v316_v29 = vld [vmem:[#allocation7 + $0x120] sm:$0xff]  ;;  %v315_v30 = vld [vmem:[#allocation7 + $0x118] sm:$0xff]  ;;  %v314_v31 = vld [vmem:[#allocation7 + $0x110] sm:$0xff] }
  0x53   :  { %168 = vmatpush1.msra.mxu0 %v93_v50  ;;  %382 = vmatprep.subr.mxu1 %v285_v60  ;;  %v313_v32 = vld [vmem:[#allocation7 + $0x108] sm:$0xff]  ;;  %v312_v33 = vld [vmem:[#allocation7 + $0x100] sm:$0xff]  ;;  %v530_v34 = vld [vmem:[#allocation8 + $0xf8] sm:$0xff] }
  0x54   :  { %202 = vmatmul.mubr.f32.vlgmr.msra.gmra.mxu0 %v92_v51  ;;  %383 = vmatpush1.msra.mxu1 %v284_v61  ;;  %v529_v35 = vld [vmem:[#allocation8 + $0xf0] sm:$0xff]  ;;  %v528_v36 = vld [vmem:[#allocation8 + $0xe8] sm:$0xff]  ;;  %v527_v37 = vld [vmem:[#allocation8 + $0xe0] sm:$0xff] }
  0x55   :  { %384 = vmatprep.subr.mxu1 %v283_v62  ;;  %575 = vmatprep.subr.mxu0 %v530_v34  ;;  %v526_v38 = vld [vmem:[#allocation8 + $0xd8] sm:$0xff]  ;;  %v525_v39 = vld [vmem:[#allocation8 + $0xd0] sm:$0xff]  ;;  %v524_v40 = vld [vmem:[#allocation8 + $0xc8] sm:$0xff] }
  0x56   :  { %385 = vmatpush1.msra.mxu1 %v282_v63  ;;  %576 = vmatpush1.msra.mxu0 %v529_v35  ;;  %v523_v41 = vld [vmem:[#allocation8 + $0xc0] sm:$0xff]  ;;  %v522_v42 = vld [vmem:[#allocation8 + $0xb8] sm:$0xff]  ;;  %v521_v43 = vld [vmem:[#allocation8 + $0xb0] sm:$0xff] }
  0x57   :  { %386 = vmatprep.subr.mxu1 %v281_v0  ;;  %577 = vmatprep.subr.mxu0 %v528_v36  ;;  %v520_v44 = vld [vmem:[#allocation8 + $0xa8] sm:$0xff]  ;;  %v519_v45 = vld [vmem:[#allocation8 + $0xa0] sm:$0xff]  ;;  %v518_v46 = vld [vmem:[#allocation8 + $0x98] sm:$0xff] }
  0x58   :  { %387 = vmatpush1.msra.mxu1 %v280_v1  ;;  %578 = vmatpush1.msra.mxu0 %v527_v37  ;;  %v517_v47 = vld [vmem:[#allocation8 + $0x90] sm:$0xff]  ;;  %v516_v48 = vld [vmem:[#allocation8 + $0x88] sm:$0xff]  ;;  %v515_v49 = vld [vmem:[#allocation8 + $0x80] sm:$0xff] }
  0x59   :  { %388 = vmatprep.subr.mxu1 %v343_v2  ;;  %579 = vmatprep.subr.mxu0 %v526_v38  ;;  %v514_v50 = vld [vmem:[#allocation8 + $0x78] sm:$0xff]  ;;  %v513_v51 = vld [vmem:[#allocation8 + $0x70] sm:$0xff]  ;;  %v512_v53 = vld [vmem:[#allocation8 + $0x68] sm:$0xff] }
  0x5a   :  { %389 = vmatpush2.msra.mxu1 %v342_v3  ;;  %580 = vmatpush1.msra.mxu0 %v525_v39  ;;  %v125_v55 = vld [vmem:[%s922_s2] sm:$0x3] }
  0x5b   :  { %390 = vmatprep.subr.mxu1 %v341_v4  ;;  %581 = vmatprep.subr.mxu0 %v524_v40  ;;  %v130_v57 = vrot.slane %v125_v55, %v878_v54  ;;  %v134_v58 = vrot.slane %v125_v55, %v883_v56  ;;  %v242_v35 = vld [vmem:[%s923_s3] sm:$0x3]  ;;  %v511_v55 = vld [vmem:[#allocation8 + $0x60] sm:$0xff] }
  0x5c   :  { %391 = vmatpush2.msra.mxu1 %v340_v5  ;;  %582 = vmatpush1.msra.mxu0 %v523_v41  ;;  %v249_v37 = vrot.slane %v242_v35, %v878_v54  ;;  %v253_v39 = vrot.slane %v242_v35, %v883_v56  ;;  %v264_v40 = vld [vmem:[%s924_s4] sm:$0x3]  ;;  %v532_v35 = vld [vmem:[#allocation8 + $0x108] sm:$0xff] }
  0x5d   :  { %392 = vmatprep.subr.mxu1 %v339_v6  ;;  %583 = vmatprep.subr.mxu0 %v522_v42 }
  0x5e   :  { %393 = vmatpush2.msra.mxu1 %v338_v7  ;;  %584 = vmatpush1.msra.mxu0 %v521_v43  ;;  %v269_v43 = vrot.slane %v264_v40, %v878_v54 }
  0x5f   :  { %394 = vmatprep.subr.mxu1 %v337_v8  ;;  %585 = vmatprep.subr.mxu0 %v520_v44 }
  0x60   :  { %395 = vmatpush2.msra.mxu1 %v336_v9  ;;  %586 = vmatpush1.msra.mxu0 %v519_v45 }
  0x61   :  { %396 = vmatprep.subr.mxu1 %v335_v10  ;;  %587 = vmatprep.subr.mxu0 %v518_v46  ;;  %v273_v46 = vrot.slane %v264_v40, %v883_v56 }
  0x62   :  { %397 = vmatpush2.msra.mxu1 %v334_v11  ;;  %588 = vmatpush1.msra.mxu0 %v517_v47 }
  0x63   :  { %398 = vmatprep.subr.mxu1 %v333_v12  ;;  %589 = vmatprep.subr.mxu0 %v516_v48 }
  0x64   :  { %399 = vmatpush2.msra.mxu1 %v332_v13  ;;  %590 = vmatpush1.msra.mxu0 %v515_v49 }
  0x65   :  { %400 = vmatprep.subr.mxu1 %v331_v14  ;;  %591 = vmatprep.subr.mxu0 %v514_v50 }
  0x66   :  { %401 = vmatpush2.msra.mxu1 %v330_v15  ;;  %592 = vmatpush1.msra.mxu0 %v513_v51 }
  0x67   :  { %402 = vmatprep.subr.mxu1 %v329_v16  ;;  %593 = vmatprep.subr.mxu0 %v512_v53 }
  0x68   :  { %403 = vmatpush2.msra.mxu1 %v328_v17  ;;  %594 = vmatpush1.msra.mxu0 %v511_v55 }
  0x69   :  { %404 = vmatprep.subr.mxu1 %v327_v18 }
  0x6a   :  { %405 = vmatpush2.msra.mxu1 %v326_v19 }
  0x6b   :  { %406 = vmatprep.subr.mxu1 %v325_v20 }
  0x6c   :  { %407 = vmatpush2.msra.mxu1 %v324_v21 }
  0x6d   :  { %408 = vmatprep.subr.mxu1 %v323_v22 }
  0x6e   :  { %409 = vmatpush2.msra.mxu1 %v322_v23 }
  0x6f   :  { %410 = vmatprep.subr.mxu1 %v321_v24 }
  0x70   :  { %411 = vmatpush2.msra.mxu1 %v320_v25 }
  0x71   :  { %412 = vmatprep.subr.mxu1 %v319_v26 }
  0x72   :  { %413 = vmatpush2.msra.mxu1 %v318_v27 }
  0x73   :  { %414 = vmatprep.subr.mxu1 %v317_v28 }
  0x74   :  { %415 = vmatpush2.msra.mxu1 %v316_v29 }
  0x75   :  { %416 = vmatprep.subr.mxu1 %v315_v30 }
  0x76   :  { %417 = vmatpush2.msra.mxu1 %v314_v31 }
  0x77   :  { %418 = vmatprep.subr.mxu1 %v313_v32 }
  0x78   :  { %419 = vmatpush2.msra.mxu1 %v312_v33 }
 0x114   :  { %v203_v59 = vpop.f32.mrf.mxu0 }
 0x115   :  { %v204_v60 = vadd.f32 %v203_v59, %v130_v57  ;;  %v510_v57 = vld [vmem:[#allocation8 + $0x58] sm:$0xff]  ;;  %v508_v59 = vld [vmem:[#allocation8 + $0x48] sm:$0xff] }
 0x116   :  { %v205_v61 = vpop.f32.mrf.mxu0  ;;  %595 = vmatprep.subr.mxu0 %v510_v57 }
 0x117   :  { %v208_v62 = vrot.slane %v204_v60, 4  ;;  %v222_v63 = vmul.f32 %v204_v60, %v204_v60  ;;  %v206_v0 = vadd.f32 %v205_v61, %v134_v58  ;;  %v509_v58 = vld [vmem:[#allocation8 + $0x50] sm:$0xff]  ;;  %v506_v61 = vld [vmem:[#allocation8 + $0x38] sm:$0xff] }
 0x118   :  { %596 = vmatpush1.msra.mxu0 %v509_v58 }
 0x119   :  { %v209_v1 = vadd.f32 %v208_v62, %v204_v60  ;;  %v224_v2 = vrot.slane %v222_v63, 4  ;;  %v214_v3 = vrot.slane %v206_v0, 4  ;;  %v223_v4 = vmul.f32 %v206_v0, %v206_v0  ;;  %597 = vmatprep.subr.mxu0 %v508_v59  ;;  %v505_v62 = vld [vmem:[#allocation8 + $0x30] sm:$0xff] }
 0x11b   :  { %v210_v5 = vrot.slane %v209_v1, 2  ;;  %v225_v6 = vadd.f32 %v224_v2, %v222_v63  ;;  %v215_v7 = vadd.f32 %v214_v3, %v206_v0  ;;  %v230_v8 = vrot.slane %v223_v4, 4  ;;  %v504_v63 = vld [vmem:[#allocation8 + $0x28] sm:$0xff]  ;;  %v501_v2 = vld [vmem:[#allocation8 + $0x10] sm:$0xff] }
 0x11c   :  { %v500_v3 = vld [vmem:[#allocation8 + $0x8] sm:$0xff] }
 0x11d   :  { %v211_v9 = vadd.f32 %v210_v5, %v209_v1  ;;  %v226_v10 = vrot.slane %v225_v6, 2  ;;  %v216_v11 = vrot.slane %v215_v7, 2  ;;  %v231_v12 = vadd.f32 %v230_v8, %v223_v4  ;;  %v502_v1 = vld [vmem:[#allocation8 + $0x18] sm:$0xff]  ;;  %v499_v4 = vld [vmem:[#allocation8] sm:$0xff] }
 0x11e   :  { %v562_v5 = vld [vmem:[#allocation8 + $0x1f8] sm:$0xff]  ;;  %v559_v8 = vld [vmem:[#allocation8 + $0x1e0] sm:$0xff] }
 0x11f   :  { %v212_v13 = vrot.slane %v211_v9, 1  ;;  %v227_v14 = vadd.f32 %v226_v10, %v225_v6  ;;  %v217_v15 = vadd.f32 %v216_v11, %v215_v7  ;;  %v232_v16 = vrot.slane %v231_v12, 2  ;;  %v561_v6 = vld [vmem:[#allocation8 + $0x1f0] sm:$0xff]  ;;  %v560_v7 = vld [vmem:[#allocation8 + $0x1e8] sm:$0xff] }
 0x120   :  { %v557_v10 = vld [vmem:[#allocation8 + $0x1d0] sm:$0xff]  ;;  %v556_v11 = vld [vmem:[#allocation8 + $0x1c8] sm:$0xff] }
 0x121   :  { %v213_v17 = vadd.f32 %v212_v13, %v211_v9  ;;  %v228_v18 = vrot.slane %v227_v14, 1  ;;  %v233_v19 = vadd.f32 %v232_v16, %v231_v12  ;;  %v218_v20 = vrot.slane %v217_v15, 1  ;;  %v558_v9 = vld [vmem:[#allocation8 + $0x1d8] sm:$0xff]  ;;  %v555_v12 = vld [vmem:[#allocation8 + $0x1c0] sm:$0xff] }
 0x122   :  { %v554_v13 = vld [vmem:[#allocation8 + $0x1b8] sm:$0xff]  ;;  %v551_v16 = vld [vmem:[#allocation8 + $0x1a0] sm:$0xff] }
 0x123   :  { %v220_v21 = vmul.f32 0.125, %v213_v17  ;;  %v229_v22 = vadd.f32 %v228_v18, %v227_v14  ;;  %v234_v23 = vrot.slane %v233_v19, 1  ;;  %v219_v24 = vadd.f32 %v218_v20, %v217_v15  ;;  %v553_v14 = vld [vmem:[#allocation8 + $0x1b0] sm:$0xff]  ;;  %v552_v15 = vld [vmem:[#allocation8 + $0x1a8] sm:$0xff]  ;;  %v550_v17 = vld [vmem:[#allocation8 + $0x198] sm:$0xff] }
 0x124   :  { %v549_v18 = vld [vmem:[#allocation8 + $0x190] sm:$0xff]  ;;  %v547_v20 = vld [vmem:[#allocation8 + $0x180] sm:$0xff] }
 0x125   :  { %v236_v25 = vmul.f32 0.125, %v229_v22  ;;  %v238_v26 = vmul.f32 %v220_v21, %v220_v21  ;;  %v235_v27 = vadd.f32 %v234_v23, %v233_v19  ;;  %v221_v28 = vmul.f32 0.125, %v219_v24  ;;  %v548_v19 = vld [vmem:[#allocation8 + $0x188] sm:$0xff]  ;;  %v545_v22 = vld [vmem:[#allocation8 + $0x170] sm:$0xff]  ;;  %v543_v24 = vld [vmem:[#allocation8 + $0x160] sm:$0xff] }
 0x126   :  { %v243_v36 = vsub.f32 %v204_v60, %v220_v21  ;;  %v507_v60 = vld [vmem:[#allocation8 + $0x40] sm:$0xff]  ;;  %v546_v21 = vld [vmem:[#allocation8 + $0x178] sm:$0xff]  ;;  %v544_v23 = vld [vmem:[#allocation8 + $0x168] sm:$0xff] }
 0x127   :  { %v240_v29 = vsub.f32 %v236_v25, %v238_v26  ;;  %v237_v30 = vmul.f32 0.125, %v235_v27  ;;  %v239_v31 = vmul.f32 %v221_v28, %v221_v28  ;;  %v244_v38 = vsub.f32 %v206_v0, %v221_v28  ;;  %598 = vmatpush1.msra.mxu0 %v507_v60  ;;  %v503_v0 = vld [vmem:[#allocation8 + $0x20] sm:$0xff]  ;;  %v542_v25 = vld [vmem:[#allocation8 + $0x158] sm:$0xff]  ;;  %v541_v26 = vld [vmem:[#allocation8 + $0x150] sm:$0xff] }
 0x128   :  { %v256_v41 = vmul.f32 %v249_v37, %v243_v36  ;;  %599 = vmatprep.subr.mxu0 %v506_v61  ;;  %v540_v27 = vld [vmem:[#allocation8 + $0x148] sm:$0xff]  ;;  %v539_v28 = vld [vmem:[#allocation8 + $0x140] sm:$0xff]  ;;  %v344_v37 = vld [vmem:[%s926_s6] sm:$0x3] }
 0x129   :  { %v258_v32 = vadd.f32 1e-05, %v240_v29  ;;  %v241_v33 = vsub.f32 %v237_v30, %v239_v31  ;;  %v257_v45 = vmul.f32 %v253_v39, %v244_v38  ;;  %600 = vmatpush1.msra.mxu0 %v505_v62  ;;  %v538_v29 = vld [vmem:[#allocation8 + $0x138] sm:$0xff]  ;;  %v537_v30 = vld [vmem:[#allocation8 + $0x130] sm:$0xff]  ;;  %v536_v31 = vld [vmem:[#allocation8 + $0x128] sm:$0xff]  ;;  %v349_v38 = vrot.slane %v344_v37, %v878_v54 }
 0x12a   :  { %601 = vmatprep.subr.mxu0 %v504_v63  ;;  %v531_v36 = vld [vmem:[#allocation8 + $0x100] sm:$0xff]  ;;  %v353_v39 = vrot.slane %v344_v37, %v883_v56 }
 0x12b   :  { %673 = vrsqrt.f32 %v258_v32  ;;  %v259_v34 = vadd.f32 1e-05, %v241_v33  ;;  %602 = vmatpush1.msra.mxu0 %v503_v0  ;;  %v535_v32 = vld [vmem:[#allocation8 + $0x120] sm:$0xff]  ;;  %v534_v33 = vld [vmem:[#allocation8 + $0x118] sm:$0xff] }
 0x12c   :  { %603 = vmatprep.subr.mxu0 %v502_v1 }
 0x12d   :  { %675 = vrsqrt.f32 %v259_v34  ;;  %604 = vmatpush1.msra.mxu0 %v501_v2  ;;  %v533_v34 = vld [vmem:[#allocation8 + $0x110] sm:$0xff] }
 0x12e   :  { %605 = vmatprep.subr.mxu0 %v500_v3 }
 0x12f   :  { %606 = vmatpush1.msra.mxu0 %v499_v4 }
 0x130   :  { %607 = vmatprep.subr.mxu0 %v562_v5 }
 0x131   :  { %608 = vmatpush2.msra.mxu0 %v561_v6 }
 0x132   :  { %609 = vmatprep.subr.mxu0 %v560_v7 }
 0x133   :  { %610 = vmatpush2.msra.mxu0 %v559_v8 }
 0x134   :  { %611 = vmatprep.subr.mxu0 %v558_v9 }
 0x135   :  { %612 = vmatpush2.msra.mxu0 %v557_v10 }
 0x136   :  { %613 = vmatprep.subr.mxu0 %v556_v11 }
 0x137   :  { %614 = vmatpush2.msra.mxu0 %v555_v12 }
 0x138   :  { %v674_v42 = vpop.eup %673  ;;  %615 = vmatprep.subr.mxu0 %v554_v13 }
 0x139   :  { %v262_v44 = vmul.f32 %v674_v42, %v256_v41  ;;  %616 = vmatpush2.msra.mxu0 %v553_v14 }
 0x13a   :  { %v676_v47 = vpop.eup %675  ;;  %617 = vmatprep.subr.mxu0 %v552_v15 }
 0x13b   :  { %v263_v48 = vmul.f32 %v676_v47, %v257_v45  ;;  %v276_v49 = vadd.f32 %v269_v43, %v262_v44  ;;  %618 = vmatpush2.msra.mxu0 %v551_v16 }
 0x13c   :  { %619 = vmatprep.subr.mxu0 %v550_v17 }
 0x13d   :  { %v277_v50 = vadd.f32 %v273_v46, %v263_v48  ;;  %v278_v52 = vmax.f32 %v276_v49, 0.0  ;;  %620 = vmatpush2.msra.mxu0 %v549_v18  ;;  %v461_v18 = vld [vmem:[%s927_s7] sm:$0x3] }
 0x13e   :  { %621 = vmatprep.subr.mxu0 %v548_v19 }
 0x13f   :  { %v279_v51 = vmax.f32 %v277_v50, 0.0  ;;  %622 = vmatpush2.msra.mxu0 %v547_v20  ;;  %v468_v20 = vrot.slane %v461_v18, %v878_v54 }
 0x140   :  { %623 = vmatprep.subr.mxu0 %v546_v21 }
 0x141   :  { %420 = vmatprep.mubr.f32.mxu1 %v279_v51  ;;  %624 = vmatpush2.msra.mxu0 %v545_v22  ;;  %v472_v22 = vrot.slane %v461_v18, %v883_v56 }
 0x142   :  { %421 = vmatmul.mubr.f32.vlgmr.msra.gmra.mxu1 %v278_v52  ;;  %625 = vmatprep.subr.mxu0 %v544_v23  ;;  %v483_v23 = vld [vmem:[%s928_s8] sm:$0x3]  ;;  %s796_s8 = smov [#allocation10]  }
 0x143   :  { %626 = vmatpush2.msra.mxu0 %v543_v24  ;;  %s654_s25 = sshll.u32 %s796_s8, 4  ;;  %s655_s25 = int_to_ptr.vmem [resolvable:$true] %s654_s25 }
 0x144   :  { %627 = vmatprep.subr.mxu0 %v542_v25  ;;  %s761_s26 = scalar_lea.vmem %s655_s25, 256  ;;  %p766_p7 = scmp.lt.s32.totalorder %s655_s25, %s655_s25 }
 0x145   :  { %628 = vmatpush2.msra.mxu0 %v541_v26  ;;  %v488_v26 = vrot.slane %v483_v23, %v878_v54  ;;  %p762_p6 = scmp.ne.s32.totalorder %s655_s25, %s761_s26  ;;  %p767_p8 = scmp.lt.s32.totalorder %s761_s26, %s761_s26 }
 0x146   :  { %629 = vmatprep.subr.mxu0 %v540_v27 }
 0x147   :  { %630 = vmatpush2.msra.mxu0 %v539_v28  ;;  %p768_p9 = por %p767_p8, %p766_p7 }
 0x148   :  { %631 = vmatprep.subr.mxu0 %v538_v29  ;;  %v492_v29 = vrot.slane %v483_v23, %v883_v56 }
 0x149   :  { %632 = vmatpush2.msra.mxu0 %v537_v30  ;;  %p769_p10 = pnand %p768_p9, %p762_p6 }
 0x14a   :  { %633 = vmatprep.subr.mxu0 %v536_v31 }
 0x14b   :  { %634 = vmatpush2.msra.mxu0 %v535_v32 }
 0x14c   :  { %635 = vmatprep.subr.mxu0 %v534_v33 }
 0x14d   :  { %636 = vmatpush2.msra.mxu0 %v533_v34 }
 0x14e   :  { %637 = vmatprep.subr.mxu0 %v532_v35 }
 0x14f   :  { %638 = vmatpush2.msra.mxu0 %v531_v36  ;;  %v563_v36 = vld [vmem:[%s930_s10] sm:$0x3] }
 0x150   :  { %v568_v37 = vrot.slane %v563_v36, %v878_v54 }
 0x202   :  { %v422_v40 = vpop.f32.mrf.mxu1 }
 0x203   :  { %v423_v41 = vadd.f32 %v422_v40, %v349_v38  ;;  %v572_v38 = vrot.slane %v563_v36, %v883_v56 }
 0x204   :  { %v424_v42 = vpop.f32.mrf.mxu1 }
 0x205   :  { %v427_v43 = vrot.slane %v423_v41, 4  ;;  %v441_v44 = vmul.f32 %v423_v41, %v423_v41  ;;  %v425_v45 = vadd.f32 %v424_v42, %v353_v39 }
 0x207   :  { %v428_v46 = vadd.f32 %v427_v43, %v423_v41  ;;  %v443_v47 = vrot.slane %v441_v44, 4  ;;  %v433_v48 = vrot.slane %v425_v45, 4  ;;  %v442_v49 = vmul.f32 %v425_v45, %v425_v45 }
 0x209   :  { %v429_v50 = vrot.slane %v428_v46, 2  ;;  %v444_v51 = vadd.f32 %v443_v47, %v441_v44  ;;  %v434_v52 = vadd.f32 %v433_v48, %v425_v45  ;;  %v449_v53 = vrot.slane %v442_v49, 4 }
 0x20b   :  { %v430_v55 = vadd.f32 %v429_v50, %v428_v46  ;;  %v445_v57 = vrot.slane %v444_v51, 2  ;;  %v435_v58 = vrot.slane %v434_v52, 2  ;;  %v450_v59 = vadd.f32 %v449_v53, %v442_v49 }
 0x20d   :  { %v431_v60 = vrot.slane %v430_v55, 1  ;;  %v446_v61 = vadd.f32 %v445_v57, %v444_v51  ;;  %v436_v62 = vadd.f32 %v435_v58, %v434_v52  ;;  %v451_v63 = vrot.slane %v450_v59, 2 }
 0x20f   :  { %v432_v0 = vadd.f32 %v431_v60, %v430_v55  ;;  %v447_v1 = vrot.slane %v446_v61, 1  ;;  %v437_v2 = vrot.slane %v436_v62, 1  ;;  %v452_v3 = vadd.f32 %v451_v63, %v450_v59 }
 0x211   :  { %v439_v4 = vmul.f32 0.125, %v432_v0  ;;  %v448_v5 = vadd.f32 %v447_v1, %v446_v61  ;;  %v438_v6 = vadd.f32 %v437_v2, %v436_v62  ;;  %v453_v7 = vrot.slane %v452_v3, 1 }
 0x213   :  { %v455_v8 = vmul.f32 0.125, %v448_v5  ;;  %v457_v9 = vmul.f32 %v439_v4, %v439_v4  ;;  %v440_v10 = vmul.f32 0.125, %v438_v6  ;;  %v454_v11 = vadd.f32 %v453_v7, %v452_v3 }
 0x214   :  { %v462_v19 = vsub.f32 %v423_v41, %v439_v4 }
 0x215   :  { %v459_v12 = vsub.f32 %v455_v8, %v457_v9  ;;  %v458_v13 = vmul.f32 %v440_v10, %v440_v10  ;;  %v456_v14 = vmul.f32 0.125, %v454_v11  ;;  %v463_v21 = vsub.f32 %v425_v45, %v440_v10 }
 0x216   :  { %v475_v24 = vmul.f32 %v468_v20, %v462_v19 }
 0x217   :  { %v477_v15 = vadd.f32 1e-05, %v459_v12  ;;  %v460_v16 = vsub.f32 %v456_v14, %v458_v13  ;;  %v476_v28 = vmul.f32 %v472_v22, %v463_v21 }
 0x219   :  { %677 = vrsqrt.f32 %v477_v15  ;;  %v478_v17 = vadd.f32 1e-05, %v460_v16 }
 0x21b   :  { %679 = vrsqrt.f32 %v478_v17 }
 0x226   :  { %v678_v25 = vpop.eup %677 }
 0x227   :  { %v481_v27 = vmul.f32 %v678_v25, %v475_v24 }
 0x228   :  { %v680_v30 = vpop.eup %679 }
 0x229   :  { %v482_v31 = vmul.f32 %v680_v30, %v476_v28  ;;  %v495_v32 = vadd.f32 %v488_v26, %v481_v27 }
 0x22b   :  { %v496_v33 = vadd.f32 %v492_v29, %v482_v31  ;;  %v497_v35 = vmax.f32 %v495_v32, 0.0 }
 0x22d   :  { %v498_v34 = vmax.f32 %v496_v33, 0.0 }
 0x22f   :  { %639 = vmatprep.mubr.f32.mxu0 %v498_v34 }
 0x230   :  { %640 = vmatmul.mubr.f32.vlgmr.msra.gmra.mxu0 %v497_v35 }
 0x2f0   :  { %v641_v39 = vpop.f32.mrf.mxu0 }
 0x2f1   :  { %v642_v40 = vadd.f32 %v641_v39, %v568_v37 }
 0x2f2   :  { %v643_v41 = vpop.f32.mrf.mxu0 }
 0x2f3   :  { %646 = vst [vmem:[#allocation10] sm:$0xff] %v642_v40  ;;  %v644_v42 = vadd.f32 %v643_v41, %v572_v38 }
 0x2f5   :  { %647 = vst [vmem:[#allocation10 + $0x8] sm:$0xff] %v644_v42 }
 0x2f6   :  { %772 = shalt.err (!%p769_p10)
}
 0x2f7   :  { %657 = dma.vmem_to_hbm [thread:$0]  %s655_s25, 256, %s931_s11, [#allocation4]  }
 0x2f8   :  { %787 = dma.done.wait [#allocation4], 256  }
 0x2f9   :  { %788 = vsyncadd [#allocation4], 4294967040 }
 0x2fa   :  { %661 = vsyncpa [#allocation3], 1 }
 0x2fb   :  { %662 = vsyncpa [#allocation6], 1 }
 0x2fc   :  { %663 = vsyncpa [#allocation9], 1 }
 0x2fd   :  { %664 = vsyncpa [#allocation4], 1 }

</bundles_post_ra>
